<compile_context>
chip_gen: v7x
topology: tpu7x:2x2x1
jax: 0.10.0
libtpu: 0.0.40
codegen_flags: <defaults>
</compile_context>

<pallas_src>
import jax
import jax.numpy as jnp
from jax.experimental import pallas as pl
from jax.experimental.pallas import tpu as pltpu


def _alias_kernel(x_hbm_ref, o_hbm_ref):
    # Output buffer *is* the input buffer (input_output_aliases={0: 0}), so
    # there is nothing to compute and nothing to move.  touch() adds a fake
    # read+write dependency so the aliased output is ordered after the launch.
    del x_hbm_ref
    pltpu.touch(o_hbm_ref)


def _identity_alias(x):
    """Zero-HBM-traffic identity: alias the input buffer to the output."""
    return pl.pallas_call(
        _alias_kernel,
        out_shape=jax.ShapeDtypeStruct(x.shape, x.dtype),
        in_specs=[pl.BlockSpec(memory_space=pl.ANY)],
        out_specs=pl.BlockSpec(memory_space=pl.ANY),
        input_output_aliases={0: 0},
        cost_estimate=pl.CostEstimate(
            flops=0, transcendentals=0, bytes_accessed=0),
    )(x)


def _copy_kernel(x_hbm_ref, o_hbm_ref, sem):
    # One direct HBM->HBM DMA for the whole array: no VMEM staging, no
    # per-step pipeline overhead; the DMA engine alone saturates HBM.
    cp = pltpu.make_async_copy(x_hbm_ref, o_hbm_ref, sem)
    cp.start()
    cp.wait()


def _identity_copy(x):
    """Materializing identity: fresh output buffer via a direct HBM->HBM DMA."""
    nbytes = x.size * x.dtype.itemsize
    return pl.pallas_call(
        _copy_kernel,
        out_shape=jax.ShapeDtypeStruct(x.shape, x.dtype),
        in_specs=[pl.BlockSpec(memory_space=pl.ANY)],
        out_specs=pl.BlockSpec(memory_space=pl.ANY),
        scratch_shapes=[pltpu.SemaphoreType.DMA],
        cost_estimate=pl.CostEstimate(
            flops=0, transcendentals=0, bytes_accessed=2 * nbytes),
    )(x)


def identity_forward(x):
    """Pallas implementation of Identity.forward: returns x (same values).

    Prefers the aliased zero-copy launch; falls back to the direct HBM->HBM
    DMA copy if the aliased empty-body kernel is rejected by the installed
    Pallas/Mosaic version.
    """
    try:
        return _identity_alias(x)
    except Exception:  # pragma: no cover - version-dependent lowering fallback
        return _identity_copy(x)


if __name__ == "__main__":
    key = jax.random.PRNGKey(0)

    # Small shape consistent with the module's usage: (B, C, H, W).
    B, C, H, W = 2, 4, 16, 16
    x = jax.random.normal(key, (B, C, H, W), dtype=jnp.float32)

    out = jax.block_until_ready(identity_forward(x))
    assert out.shape == x.shape
    assert out.dtype == x.dtype
    assert jnp.array_equal(out, x)

    # Robustness: odd (non multiple-of-128/8) size and a narrow dtype —
    # neither path has lane/sublane shape constraints.
    y = jax.random.normal(jax.random.PRNGKey(1), (3, 5, 7), dtype=jnp.bfloat16)
    out_y = jax.block_until_ready(identity_forward(y))
    assert out_y.shape == y.shape and out_y.dtype == y.dtype
    assert jnp.array_equal(out_y, y)

    print("KERNEL_OK")
</pallas_src>

<mosaic_0001>
module attributes {stable_mosaic.version = 11 : i64} {
  func.func @_alias_kernel(%arg0: memref<2x4x16x16xf32, #tpu.memory_space<any>>, %arg1: memref<2x4x16x16xf32, #tpu.memory_space<any>>) attributes {dimension_semantics = [], scalar_prefetch = 0 : i64, scratch_operands = 0 : i64, tpu.core_type = #tpu.core_type<tc>} {
    return
  }
}

module attributes {stable_mosaic.version = 11 : i64} {
  func.func @_copy_kernel(%arg0: memref<2x4x16x16xf32, #tpu.memory_space<any>>, %arg1: memref<2x4x16x16xf32, #tpu.memory_space<any>>, %arg2: memref<!tpu.dma_semaphore, #tpu.memory_space<semaphore_mem>>) attributes {dimension_semantics = [], scalar_prefetch = 0 : i64, scratch_operands = 1 : i64, tpu.core_type = #tpu.core_type<tc>} {
    tpu.enqueue_dma source(%arg0 : memref<2x4x16x16xf32, #tpu.memory_space<any>>) target(%arg1 : memref<2x4x16x16xf32, #tpu.memory_space<any>>) target_semaphore(%arg2 : memref<!tpu.dma_semaphore, #tpu.memory_space<semaphore_mem>>)
    tpu.wait_dma2 semaphore(%arg2 : memref<!tpu.dma_semaphore, #tpu.memory_space<semaphore_mem>>) src(%arg0 : memref<2x4x16x16xf32, #tpu.memory_space<any>>) dst(%arg1 : memref<2x4x16x16xf32, #tpu.memory_space<any>>)
    return
  }
}

</mosaic_0001>

<bundles_post_ra>
// kernel: tpu_custom_call.1
= control target key start
LH: loop header
LB: loop body
LE: loop exit
PB: predicated region body
PF: predicated region fallthrough
CT: control target
= control target key end

     0   :  { %s16_s0 = inlined_call_operand.hbm [shape: f32[2,4,16,16], index: 0, kind: input, shape index: {}, may-alias: {0,1}]   ;;  %s17_s1 = inlined_call_operand.hbm [shape: f32[2,4,16,16], index: 1, kind: output, shape index: {}, may-alias: {0,1}]  }

// kernel: tpu_custom_call.1
= control target key start
LH: loop header
LB: loop body
LE: loop exit
PB: predicated region body
PF: predicated region fallthrough
CT: control target
= control target key end

     0   :  { %s36_s6 = smov [#allocation2]   ;;  %s37_s7 = smov [#allocation3]   ;;  %s55_s0 = inlined_call_operand.hbm [shape: f32[2,4,16,16], index: 0, kind: input, shape index: {}]   ;;  %s56_s1 = inlined_call_operand.hbm [shape: f32[2,4,16,16], index: 1, kind: output, shape index: {}]  }
   0x1   :  { %s38_s8 = smov 0  }
   0x2   :  { %18 = dma.general %s55_s0, 2048, %s56_s1, %s36_s6, %s37_s7, [#allocation4], %s38_s8, 0  }
   0x3   :  { %34 = dma.done.wait [#allocation2], 2048 }
   0x4   :  { %35 = vsyncadd [#allocation2], 4294965248 }
   0x5   :  { %24 = vsyncmov [#allocation2] }
   0x8   :  { %s25_s13 = vpop.sfrf %24 }
   0x9   :  { %p30_p0 = scmp.ne.s32.totalorder %s25_s13, 0 }
   0xb   :  { %29 = shalt.err (%p30_p0)  }

</bundles_post_ra>
